<compile_context>
chip_gen: v6e
topology: v6e:2x2x1
jax: 0.10.0
libtpu: 0.0.40
codegen_flags: <defaults>
</compile_context>

<pallas_src>
import math

import jax
import jax.numpy as jnp
from jax.experimental import pallas as pl
from jax.experimental.pallas import tpu as pltpu


def _make_attn_kernel(num_heads, mxu_dtype, approx_reciprocal):
    H = num_heads

    def kernel(q_ref, kht_ref, vh_ref, wq_ref, bq_ref, wo_ref, bo_ref,
               out_ref, attn_ref):
        xq = q_ref[0]                                  # (tq, E) f32
        tq, e_pad = out_ref.shape[1], out_ref.shape[2]
        s_kv = attn_ref.shape[2]

        acc = jnp.zeros((tq, e_pad), jnp.float32)      # output accumulator
        wacc = jnp.zeros((tq, s_kv), jnp.float32)      # head-averaged weights acc

        # Per-head processing: only one head's scores/probs are live at a time.
        for h in range(H):
            # Q projection for this head (scale already folded into wq/bq).
            q_h = jnp.dot(xq, wq_ref[h],
                          preferred_element_type=jnp.float32) + bq_ref[h]  # (tq, Dh)

            # Scores against pre-transposed K: (tq, Dh) x (Dh, S_kv) on the MXU.
            s = jnp.dot(q_h.astype(mxu_dtype), kht_ref[0, h],
                        preferred_element_type=jnp.float32)               # (tq, S_kv)

            # Softmax in f32.
            s = s - jnp.max(s, axis=-1, keepdims=True)
            p = jnp.exp(s)
            denom = jnp.sum(p, axis=-1, keepdims=True)
            if approx_reciprocal:
                p = p * pl.reciprocal(denom, approx=True)   # EUP slot, nearly free
            else:
                p = p / denom

            # PV: (tq, S_kv) x (S_kv, Dh).
            o_h = jnp.dot(p.astype(mxu_dtype), vh_ref[0, h],
                          preferred_element_type=jnp.float32)             # (tq, Dh)

            # This head's slab of the output projection, accumulated in f32.
            acc = acc + jnp.dot(o_h, wo_ref[h],
                                preferred_element_type=jnp.float32)       # (tq, E_pad)
            wacc = wacc + p

        out_ref[0] = (acc + bo_ref[...]).astype(out_ref.dtype)
        attn_ref[0] = (wacc * (1.0 / H)).astype(attn_ref.dtype)

    return kernel


def _device_defaults():
    """Per-generation q-tile default and VMEM-limit cap."""
    try:
        kind = jax.devices()[0].device_kind.lower()
    except Exception:
        kind = ""
    if "v6" in kind:
        return 256, 96 * 2 ** 20       # 256x256 MXU, 128 MiB VMEM
    if "v5" in kind:
        return 128, 96 * 2 ** 20       # 128-wide MXU, 128 MiB VMEM
    return 128, 48 * 2 ** 20           # v7x (64 MiB VMEM) / unknown: conservative


def batch_first_mha(query, key, value, params, num_heads, *,
                    mxu_dtype=jnp.bfloat16, approx_reciprocal=True,
                    q_block=None, vmem_cap_bytes=None):
    """query/key/value: (B, S, E) f32.  Returns (output (B,S_q,E), weights (B,S_q,S_kv)).

    Defaults use bf16 MXU inputs with f32 accumulation and the EUP approximate
    reciprocal (native/fast on v5e/v6e/v7x).  Pass mxu_dtype=jnp.float32,
    approx_reciprocal=False for torch-exact numerics.
    """
    B, S_q, E = query.shape
    _, S_kv, _ = key.shape
    assert value.shape == key.shape and E % num_heads == 0
    H = num_heads
    Dh = E // H
    E_pad = 128 * pl.cdiv(E, 128)      # lane-dense output store

    dflt_qb, dflt_cap = _device_defaults()
    if q_block is None:
        q_block = dflt_qb
    if vmem_cap_bytes is None:
        vmem_cap_bytes = dflt_cap

    hp = jax.lax.Precision.HIGHEST
    scale = 1.0 / math.sqrt(Dh)

    # --- Parameter prep (one-time constant folds, head-major layouts). ---
    wq_h = (params["wq_t"] * scale).reshape(E, H, Dh).transpose(1, 0, 2)  # (H, E, Dh)
    bq_h = (params["bq"] * scale).reshape(H, Dh)[:, None, :]              # (H, 1, Dh)
    wo, bo = params["wo_t"], params["bo"]
    if E_pad != E:
        wo = jnp.pad(wo, ((0, 0), (0, E_pad - E)))
        bo = jnp.pad(bo, ((0, 0), (0, E_pad - E)))
    wo_h = wo.reshape(H, Dh, E_pad)                                       # (H, Dh, E_pad)

    # --- K/V projections hoisted out of the q-tile loop (done once, XLA). ---
    k = jnp.einsum("bse,ef->bsf", key, params["wk_t"], precision=hp) + params["bk"]
    v = jnp.einsum("bse,ef->bsf", value, params["wv_t"], precision=hp) + params["bv"]
    khT = k.reshape(B, S_kv, H, Dh).transpose(0, 2, 3, 1).astype(mxu_dtype)  # (B,H,Dh,S_kv)
    vh = v.reshape(B, S_kv, H, Dh).transpose(0, 2, 1, 3).astype(mxu_dtype)   # (B,H,S_kv,Dh)

    # --- Query-sequence tiling (only when it yields (8,128)-legal blocks). ---
    tq = S_q
    for cand in (q_block, 128):
        if cand <= S_q and cand % 8 == 0 and S_q % cand == 0:
            tq = cand
            break
    n_q = S_q // tq

    # --- VMEM budget: pipeline blocks (x2 buffers) + in-kernel intermediates. ---
    f32b = 4
    kvb = jnp.dtype(mxu_dtype).itemsize
    block_bytes = (f32b * tq * E                 # xq tile
                   + kvb * 2 * E * S_kv          # khT + vh (H*Dh == E)
                   + f32b * tq * E_pad           # output tile
                   + f32b * tq * S_kv)           # attention-weights tile
    weight_bytes = f32b * (H * E * Dh + H * Dh + H * Dh * E_pad + E_pad)
    interm_bytes = f32b * (3 * tq * S_kv + tq * E_pad + 2 * tq * Dh)
    est = 2 * (block_bytes + weight_bytes) + interm_bytes
    vmem_limit = int(min(max(int(1.5 * est), 16 * 2 ** 20), vmem_cap_bytes))

    kernel = _make_attn_kernel(H, mxu_dtype, approx_reciprocal)

    out, weights = pl.pallas_call(
        kernel,
        out_shape=(
            jax.ShapeDtypeStruct((B, S_q, E_pad), query.dtype),
            jax.ShapeDtypeStruct((B, S_q, S_kv), jnp.float32),
        ),
        grid_spec=pltpu.PrefetchScalarGridSpec(
            num_scalar_prefetch=0,
            grid=(B, n_q),
            in_specs=[
                pl.BlockSpec((1, tq, E), lambda b, qi: (b, qi, 0)),
                # Pre-projected, head-major K^T / V: constant across q-tiles
                # (re-DMA'd only when the batch index changes).
                pl.BlockSpec((1, H, Dh, S_kv), lambda b, qi: (b, 0, 0, 0)),
                pl.BlockSpec((1, H, S_kv, Dh), lambda b, qi: (b, 0, 0, 0)),
                # Constant-index resident weights/biases.
                pl.BlockSpec((H, E, Dh), lambda b, qi: (0, 0, 0)),
                pl.BlockSpec((H, 1, Dh), lambda b, qi: (0, 0, 0)),
                pl.BlockSpec((H, Dh, E_pad), lambda b, qi: (0, 0, 0)),
                pl.BlockSpec((1, E_pad), lambda b, qi: (0, 0)),
            ],
            out_specs=[
                pl.BlockSpec((1, tq, E_pad), lambda b, qi: (b, qi, 0)),
                pl.BlockSpec((1, tq, S_kv), lambda b, qi: (b, qi, 0)),
            ],
        ),
        compiler_params=pltpu.CompilerParams(
            dimension_semantics=("parallel", "parallel"),
            vmem_limit_bytes=vmem_limit,
        ),
    )(query, khT, vh, wq_h, bq_h, wo_h, bo)

    if E_pad != E:
        out = out[..., :E]
    return out, weights


def _reference_mha(query, key, value, params, num_heads):
    """Pure-JAX reference mirroring torch.nn.MultiheadAttention forward."""
    hp = jax.lax.Precision.HIGHEST
    B, S_q, E = query.shape
    _, S_kv, _ = key.shape
    Dh = E // num_heads
    q = jnp.einsum("bse,ef->bsf", query, params["wq_t"], precision=hp) + params["bq"]
    k = jnp.einsum("bse,ef->bsf", key, params["wk_t"], precision=hp) + params["bk"]
    v = jnp.einsum("bse,ef->bsf", value, params["wv_t"], precision=hp) + params["bv"]
    q = q.reshape(B, S_q, num_heads, Dh).transpose(0, 2, 1, 3) / math.sqrt(Dh)
    k = k.reshape(B, S_kv, num_heads, Dh).transpose(0, 2, 1, 3)
    v = v.reshape(B, S_kv, num_heads, Dh).transpose(0, 2, 1, 3)
    s = jnp.einsum("bhqd,bhkd->bhqk", q, k, precision=hp)
    p = jax.nn.softmax(s, axis=-1)
    o = jnp.einsum("bhqk,bhkd->bhqd", p, v, precision=hp)
    o = o.transpose(0, 2, 1, 3).reshape(B, S_q, E)
    o = jnp.einsum("bse,ef->bsf", o, params["wo_t"], precision=hp) + params["bo"]
    w = jnp.mean(p, axis=1)   # average over heads (PyTorch default)
    return o, w


def init_params(key, embed_dim):
    """Deterministic synthetic parameters matching nn.MultiheadAttention shapes."""
    E = embed_dim
    k1, k2, k3 = jax.random.split(key, 3)
    limit = math.sqrt(6.0 / (E + 3 * E))
    in_proj_w = jax.random.uniform(k1, (3 * E, E), jnp.float32, -limit, limit)
    in_proj_b = 0.01 * jax.random.normal(k2, (3 * E,), jnp.float32)
    lim_o = math.sqrt(1.0 / E)
    out_w = jax.random.uniform(k3, (E, E), jnp.float32, -lim_o, lim_o)
    out_b = jnp.zeros((E,), jnp.float32)
    return {
        "wq_t": in_proj_w[0:E].T,
        "wk_t": in_proj_w[E:2 * E].T,
        "wv_t": in_proj_w[2 * E:3 * E].T,
        "bq": in_proj_b[0:E].reshape(1, E),
        "bk": in_proj_b[E:2 * E].reshape(1, E),
        "bv": in_proj_b[2 * E:3 * E].reshape(1, E),
        "wo_t": out_w.T,
        "bo": out_b.reshape(1, E),
    }


if __name__ == "__main__":
    B, S, E, H = 2, 8, 32, 4
    key = jax.random.PRNGKey(0)
    kq, kk, kv, kp = jax.random.split(key, 4)
    query = jax.random.normal(kq, (B, S, E), jnp.float32)
    key_in = jax.random.normal(kk, (B, S, E), jnp.float32)
    value = jax.random.normal(kv, (B, S, E), jnp.float32)
    params = init_params(kp, E)

    ref_out, ref_w = _reference_mha(query, key_in, value, params, H)

    # Exact path: f32 MXU inputs + exact softmax division (module numerics).
    out, weights = batch_first_mha(query, key_in, value, params, H,
                                   mxu_dtype=jnp.float32,
                                   approx_reciprocal=False)
    out = jax.block_until_ready(out)
    weights = jax.block_until_ready(weights)
    assert out.shape == (B, S, E) and weights.shape == (B, S, S)
    assert jnp.allclose(out, ref_out, atol=2e-3, rtol=2e-3)
    assert jnp.allclose(weights, ref_w, atol=1e-3, rtol=1e-3)

    # Default fast path (per perf review): bf16 MXU inputs for QK^T / PV with
    # f32 accumulation + approximate EUP reciprocal; looser tolerances.
    out_f, weights_f = batch_first_mha(query, key_in, value, params, H)
    out_f = jax.block_until_ready(out_f)
    weights_f = jax.block_until_ready(weights_f)
    assert out_f.shape == (B, S, E) and weights_f.shape == (B, S, S)
    assert jnp.allclose(out_f, ref_out, atol=1e-1, rtol=5e-2)
    assert jnp.allclose(weights_f, ref_w, atol=3e-2, rtol=3e-2)

    print("KERNEL_OK")
</pallas_src>

<mosaic_0001>
module attributes {stable_mosaic.version = 11 : i64} {
  func.func @kernel(%arg0: i32, %arg1: i32, %arg2: memref<1x8x32xf32, #tpu.memory_space<vmem>>, %arg3: memref<1x4x8x8xf32, #tpu.memory_space<vmem>>, %arg4: memref<1x4x8x8xf32, #tpu.memory_space<vmem>>, %arg5: memref<4x32x8xf32, #tpu.memory_space<vmem>>, %arg6: memref<4x1x8xf32, #tpu.memory_space<vmem>>, %arg7: memref<4x8x128xf32, #tpu.memory_space<vmem>>, %arg8: memref<1x128xf32, #tpu.memory_space<vmem>>, %arg9: memref<1x8x128xf32, #tpu.memory_space<vmem>>, %arg10: memref<1x8x8xf32, #tpu.memory_space<vmem>>) attributes {dimension_semantics = [#tpu.dimension_semantics<parallel>, #tpu.dimension_semantics<parallel>], iteration_bounds = array<i64: 2, 1>, scalar_prefetch = 0 : i64, scratch_operands = 0 : i64, tpu.core_type = #tpu.core_type<tc>, window_params = [{transform_indices = @transform_0, window_bounds = array<i64: 1, 8, 32>}, {transform_indices = @transform_1, window_bounds = array<i64: 1, 4, 8, 8>}, {transform_indices = @transform_2, window_bounds = array<i64: 1, 4, 8, 8>}, {pipeline_mode = #tpu.pipeline_mode<synchronous>, transform_indices = @transform_3, window_bounds = array<i64: 4, 32, 8>}, {pipeline_mode = #tpu.pipeline_mode<synchronous>, transform_indices = @transform_4, window_bounds = array<i64: 4, 1, 8>}, {pipeline_mode = #tpu.pipeline_mode<synchronous>, transform_indices = @transform_5, window_bounds = array<i64: 4, 8, 128>}, {pipeline_mode = #tpu.pipeline_mode<synchronous>, transform_indices = @transform_6, window_bounds = array<i64: 1, 128>}, {transform_indices = @transform_7, window_bounds = array<i64: 1, 8, 128>}, {transform_indices = @transform_8, window_bounds = array<i64: 1, 8, 8>}]} {
    %c0 = arith.constant 0 : index
    %c0_0 = arith.constant 0 : index
    %c0_1 = arith.constant 0 : index
    %0 = vector.load %arg2[%c0, %c0_0, %c0_1] : memref<1x8x32xf32, #tpu.memory_space<vmem>>, vector<1x8x32xf32>
    %1 = vector.shape_cast %0 : vector<1x8x32xf32> to vector<8x32xf32>
    %cst = arith.constant 0.000000e+00 : f32
    %2 = vector.broadcast %cst : f32 to vector<8x128xf32>
    %cst_2 = arith.constant 0.000000e+00 : f32
    %3 = vector.broadcast %cst_2 : f32 to vector<8x8xf32>
    %c0_3 = arith.constant 0 : index
    %c0_4 = arith.constant 0 : index
    %c0_5 = arith.constant 0 : index
    %4 = vector.load %arg5[%c0_3, %c0_4, %c0_5] : memref<4x32x8xf32, #tpu.memory_space<vmem>>, vector<1x32x8xf32>
    %5 = vector.shape_cast %4 : vector<1x32x8xf32> to vector<32x8xf32>
    %cst_6 = arith.constant dense<0.000000e+00> : vector<8x8xf32>
    %6 = tpu.matmul %1, %5, %cst_6 {dimension_numbers = #tpu.dot_dimension_numbers<[1], [0], [0], [1], [0, 0, 1, 1], [], []>} : vector<8x32xf32>, vector<32x8xf32>, vector<8x8xf32> -> vector<8x8xf32>
    %c0_7 = arith.constant 0 : index
    %c0_8 = arith.constant 0 : index
    %c0_9 = arith.constant 0 : index
    %7 = vector.load %arg6[%c0_7, %c0_8, %c0_9] : memref<4x1x8xf32, #tpu.memory_space<vmem>>, vector<1x1x8xf32>
    %8 = vector.shape_cast %7 : vector<1x1x8xf32> to vector<1x8xf32>
    %9 = vector.broadcast %8 : vector<1x8xf32> to vector<8x8xf32>
    %10 = arith.addf %6, %9 : vector<8x8xf32>
    %c0_10 = arith.constant 0 : index
    %c0_11 = arith.constant 0 : index
    %c0_12 = arith.constant 0 : index
    %c0_13 = arith.constant 0 : index
    %11 = vector.load %arg3[%c0_10, %c0_11, %c0_12, %c0_13] : memref<1x4x8x8xf32, #tpu.memory_space<vmem>>, vector<1x1x8x8xf32>
    %12 = vector.shape_cast %11 : vector<1x1x8x8xf32> to vector<8x8xf32>
    %cst_14 = arith.constant dense<0.000000e+00> : vector<8x8xf32>
    %13 = tpu.matmul %10, %12, %cst_14 {dimension_numbers = #tpu.dot_dimension_numbers<[1], [0], [0], [1], [0, 0, 1, 1], [], []>} : vector<8x8xf32>, vector<8x8xf32>, vector<8x8xf32> -> vector<8x8xf32>
    %cst_15 = arith.constant dense<0xFF800000> : vector<8xf32>
    %14 = vector.multi_reduction <maximumf>, %13, %cst_15 [1] : vector<8x8xf32> to vector<8xf32>
    %15 = vector.shape_cast %14 : vector<8xf32> to vector<8x1xf32>
    %16 = vector.broadcast %15 : vector<8x1xf32> to vector<8x8xf32>
    %17 = arith.subf %13, %16 : vector<8x8xf32>
    %18 = math.exp %17 : vector<8x8xf32>
    %cst_16 = arith.constant dense<0.000000e+00> : vector<8xf32>
    %19 = vector.multi_reduction <add>, %18, %cst_16 [1] : vector<8x8xf32> to vector<8xf32>
    %20 = vector.shape_cast %19 : vector<8xf32> to vector<8x1xf32>
    %21 = vector.broadcast %20 : vector<8x1xf32> to vector<8x8xf32>
    %22 = arith.divf %18, %21 : vector<8x8xf32>
    %c0_17 = arith.constant 0 : index
    %c0_18 = arith.constant 0 : index
    %c0_19 = arith.constant 0 : index
    %c0_20 = arith.constant 0 : index
    %23 = vector.load %arg4[%c0_17, %c0_18, %c0_19, %c0_20] : memref<1x4x8x8xf32, #tpu.memory_space<vmem>>, vector<1x1x8x8xf32>
    %24 = vector.shape_cast %23 : vector<1x1x8x8xf32> to vector<8x8xf32>
    %cst_21 = arith.constant dense<0.000000e+00> : vector<8x8xf32>
    %25 = tpu.matmul %22, %24, %cst_21 {dimension_numbers = #tpu.dot_dimension_numbers<[1], [0], [0], [1], [0, 0, 1, 1], [], []>} : vector<8x8xf32>, vector<8x8xf32>, vector<8x8xf32> -> vector<8x8xf32>
    %c0_22 = arith.constant 0 : index
    %c0_23 = arith.constant 0 : index
    %c0_24 = arith.constant 0 : index
    %26 = vector.load %arg7[%c0_22, %c0_23, %c0_24] : memref<4x8x128xf32, #tpu.memory_space<vmem>>, vector<1x8x128xf32>
    %27 = vector.shape_cast %26 : vector<1x8x128xf32> to vector<8x128xf32>
    %cst_25 = arith.constant dense<0.000000e+00> : vector<8x128xf32>
    %28 = tpu.matmul %25, %27, %cst_25 {dimension_numbers = #tpu.dot_dimension_numbers<[1], [0], [0], [1], [0, 0, 1, 1], [], []>} : vector<8x8xf32>, vector<8x128xf32>, vector<8x128xf32> -> vector<8x128xf32>
    %29 = arith.addf %2, %28 : vector<8x128xf32>
    %30 = arith.addf %3, %22 : vector<8x8xf32>
    %c1 = arith.constant 1 : index
    %c0_26 = arith.constant 0 : index
    %c0_27 = arith.constant 0 : index
    %31 = vector.load %arg5[%c1, %c0_26, %c0_27] : memref<4x32x8xf32, #tpu.memory_space<vmem>>, vector<1x32x8xf32>
    %32 = vector.shape_cast %31 : vector<1x32x8xf32> to vector<32x8xf32>
    %cst_28 = arith.constant dense<0.000000e+00> : vector<8x8xf32>
    %33 = tpu.matmul %1, %32, %cst_28 {dimension_numbers = #tpu.dot_dimension_numbers<[1], [0], [0], [1], [0, 0, 1, 1], [], []>} : vector<8x32xf32>, vector<32x8xf32>, vector<8x8xf32> -> vector<8x8xf32>
    %c1_29 = arith.constant 1 : index
    %c0_30 = arith.constant 0 : index
    %c0_31 = arith.constant 0 : index
    %34 = vector.load %arg6[%c1_29, %c0_30, %c0_31] : memref<4x1x8xf32, #tpu.memory_space<vmem>>, vector<1x1x8xf32>
    %35 = vector.shape_cast %34 : vector<1x1x8xf32> to vector<1x8xf32>
    %36 = vector.broadcast %35 : vector<1x8xf32> to vector<8x8xf32>
    %37 = arith.addf %33, %36 : vector<8x8xf32>
    %c0_32 = arith.constant 0 : index
    %c1_33 = arith.constant 1 : index
    %c0_34 = arith.constant 0 : index
    %c0_35 = arith.constant 0 : index
    %38 = vector.load %arg3[%c0_32, %c1_33, %c0_34, %c0_35] : memref<1x4x8x8xf32, #tpu.memory_space<vmem>>, vector<1x1x8x8xf32>
    %39 = vector.shape_cast %38 : vector<1x1x8x8xf32> to vector<8x8xf32>
    %cst_36 = arith.constant dense<0.000000e+00> : vector<8x8xf32>
    %40 = tpu.matmul %37, %39, %cst_36 {dimension_numbers = #tpu.dot_dimension_numbers<[1], [0], [0], [1], [0, 0, 1, 1], [], []>} : vector<8x8xf32>, vector<8x8xf32>, vector<8x8xf32> -> vector<8x8xf32>
    %cst_37 = arith.constant dense<0xFF800000> : vector<8xf32>
    %41 = vector.multi_reduction <maximumf>, %40, %cst_37 [1] : vector<8x8xf32> to vector<8xf32>
    %42 = vector.shape_cast %41 : vector<8xf32> to vector<8x1xf32>
    %43 = vector.broadcast %42 : vector<8x1xf32> to vector<8x8xf32>
    %44 = arith.subf %40, %43 : vector<8x8xf32>
    %45 = math.exp %44 : vector<8x8xf32>
    %cst_38 = arith.constant dense<0.000000e+00> : vector<8xf32>
    %46 = vector.multi_reduction <add>, %45, %cst_38 [1] : vector<8x8xf32> to vector<8xf32>
    %47 = vector.shape_cast %46 : vector<8xf32> to vector<8x1xf32>
    %48 = vector.broadcast %47 : vector<8x1xf32> to vector<8x8xf32>
    %49 = arith.divf %45, %48 : vector<8x8xf32>
    %c0_39 = arith.constant 0 : index
    %c1_40 = arith.constant 1 : index
    %c0_41 = arith.constant 0 : index
    %c0_42 = arith.constant 0 : index
    %50 = vector.load %arg4[%c0_39, %c1_40, %c0_41, %c0_42] : memref<1x4x8x8xf32, #tpu.memory_space<vmem>>, vector<1x1x8x8xf32>
    %51 = vector.shape_cast %50 : vector<1x1x8x8xf32> to vector<8x8xf32>
    %cst_43 = arith.constant dense<0.000000e+00> : vector<8x8xf32>
    %52 = tpu.matmul %49, %51, %cst_43 {dimension_numbers = #tpu.dot_dimension_numbers<[1], [0], [0], [1], [0, 0, 1, 1], [], []>} : vector<8x8xf32>, vector<8x8xf32>, vector<8x8xf32> -> vector<8x8xf32>
    %c1_44 = arith.constant 1 : index
    %c0_45 = arith.constant 0 : index
    %c0_46 = arith.constant 0 : index
    %53 = vector.load %arg7[%c1_44, %c0_45, %c0_46] : memref<4x8x128xf32, #tpu.memory_space<vmem>>, vector<1x8x128xf32>
    %54 = vector.shape_cast %53 : vector<1x8x128xf32> to vector<8x128xf32>
    %cst_47 = arith.constant dense<0.000000e+00> : vector<8x128xf32>
    %55 = tpu.matmul %52, %54, %cst_47 {dimension_numbers = #tpu.dot_dimension_numbers<[1], [0], [0], [1], [0, 0, 1, 1], [], []>} : vector<8x8xf32>, vector<8x128xf32>, vector<8x128xf32> -> vector<8x128xf32>
    %56 = arith.addf %29, %55 : vector<8x128xf32>
    %57 = arith.addf %30, %49 : vector<8x8xf32>
    %c2 = arith.constant 2 : index
    %c0_48 = arith.constant 0 : index
    %c0_49 = arith.constant 0 : index
    %58 = vector.load %arg5[%c2, %c0_48, %c0_49] : memref<4x32x8xf32, #tpu.memory_space<vmem>>, vector<1x32x8xf32>
    %59 = vector.shape_cast %58 : vector<1x32x8xf32> to vector<32x8xf32>
    %cst_50 = arith.constant dense<0.000000e+00> : vector<8x8xf32>
    %60 = tpu.matmul %1, %59, %cst_50 {dimension_numbers = #tpu.dot_dimension_numbers<[1], [0], [0], [1], [0, 0, 1, 1], [], []>} : vector<8x32xf32>, vector<32x8xf32>, vector<8x8xf32> -> vector<8x8xf32>
    %c2_51 = arith.constant 2 : index
    %c0_52 = arith.constant 0 : index
    %c0_53 = arith.constant 0 : index
    %61 = vector.load %arg6[%c2_51, %c0_52, %c0_53] : memref<4x1x8xf32, #tpu.memory_space<vmem>>, vector<1x1x8xf32>
    %62 = vector.shape_cast %61 : vector<1x1x8xf32> to vector<1x8xf32>
    %63 = vector.broadcast %62 : vector<1x8xf32> to vector<8x8xf32>
    %64 = arith.addf %60, %63 : vector<8x8xf32>
    %c0_54 = arith.constant 0 : index
    %c2_55 = arith.constant 2 : index
    %c0_56 = arith.constant 0 : index
    %c0_57 = arith.constant 0 : index
    %65 = vector.load %arg3[%c0_54, %c2_55, %c0_56, %c0_57] : memref<1x4x8x8xf32, #tpu.memory_space<vmem>>, vector<1x1x8x8xf32>
    %66 = vector.shape_cast %65 : vector<1x1x8x8xf32> to vector<8x8xf32>
    %cst_58 = arith.constant dense<0.000000e+00> : vector<8x8xf32>
    %67 = tpu.matmul %64, %66, %cst_58 {dimension_numbers = #tpu.dot_dimension_numbers<[1], [0], [0], [1], [0, 0, 1, 1], [], []>} : vector<8x8xf32>, vector<8x8xf32>, vector<8x8xf32> -> vector<8x8xf32>
    %cst_59 = arith.constant dense<0xFF800000> : vector<8xf32>
    %68 = vector.multi_reduction <maximumf>, %67, %cst_59 [1] : vector<8x8xf32> to vector<8xf32>
    %69 = vector.shape_cast %68 : vector<8xf32> to vector<8x1xf32>
    %70 = vector.broadcast %69 : vector<8x1xf32> to vector<8x8xf32>
    %71 = arith.subf %67, %70 : vector<8x8xf32>
    %72 = math.exp %71 : vector<8x8xf32>
    %cst_60 = arith.constant dense<0.000000e+00> : vector<8xf32>
    %73 = vector.multi_reduction <add>, %72, %cst_60 [1] : vector<8x8xf32> to vector<8xf32>
    %74 = vector.shape_cast %73 : vector<8xf32> to vector<8x1xf32>
    %75 = vector.broadcast %74 : vector<8x1xf32> to vector<8x8xf32>
    %76 = arith.divf %72, %75 : vector<8x8xf32>
    %c0_61 = arith.constant 0 : index
    %c2_62 = arith.constant 2 : index
    %c0_63 = arith.constant 0 : index
    %c0_64 = arith.constant 0 : index
    %77 = vector.load %arg4[%c0_61, %c2_62, %c0_63, %c0_64] : memref<1x4x8x8xf32, #tpu.memory_space<vmem>>, vector<1x1x8x8xf32>
    %78 = vector.shape_cast %77 : vector<1x1x8x8xf32> to vector<8x8xf32>
    %cst_65 = arith.constant dense<0.000000e+00> : vector<8x8xf32>
    %79 = tpu.matmul %76, %78, %cst_65 {dimension_numbers = #tpu.dot_dimension_numbers<[1], [0], [0], [1], [0, 0, 1, 1], [], []>} : vector<8x8xf32>, vector<8x8xf32>, vector<8x8xf32> -> vector<8x8xf32>
    %c2_66 = arith.constant 2 : index
    %c0_67 = arith.constant 0 : index
    %c0_68 = arith.constant 0 : index
    %80 = vector.load %arg7[%c2_66, %c0_67, %c0_68] : memref<4x8x128xf32, #tpu.memory_space<vmem>>, vector<1x8x128xf32>
    %81 = vector.shape_cast %80 : vector<1x8x128xf32> to vector<8x128xf32>
    %cst_69 = arith.constant dense<0.000000e+00> : vector<8x128xf32>
    %82 = tpu.matmul %79, %81, %cst_69 {dimension_numbers = #tpu.dot_dimension_numbers<[1], [0], [0], [1], [0, 0, 1, 1], [], []>} : vector<8x8xf32>, vector<8x128xf32>, vector<8x128xf32> -> vector<8x128xf32>
    %83 = arith.addf %56, %82 : vector<8x128xf32>
    %84 = arith.addf %57, %76 : vector<8x8xf32>
    %c3 = arith.constant 3 : index
    %c0_70 = arith.constant 0 : index
    %c0_71 = arith.constant 0 : index
    %85 = vector.load %arg5[%c3, %c0_70, %c0_71] : memref<4x32x8xf32, #tpu.memory_space<vmem>>, vector<1x32x8xf32>
    %86 = vector.shape_cast %85 : vector<1x32x8xf32> to vector<32x8xf32>
    %cst_72 = arith.constant dense<0.000000e+00> : vector<8x8xf32>
    %87 = tpu.matmul %1, %86, %cst_72 {dimension_numbers = #tpu.dot_dimension_numbers<[1], [0], [0], [1], [0, 0, 1, 1], [], []>} : vector<8x32xf32>, vector<32x8xf32>, vector<8x8xf32> -> vector<8x8xf32>
    %c3_73 = arith.constant 3 : index
    %c0_74 = arith.constant 0 : index
    %c0_75 = arith.constant 0 : index
    %88 = vector.load %arg6[%c3_73, %c0_74, %c0_75] : memref<4x1x8xf32, #tpu.memory_space<vmem>>, vector<1x1x8xf32>
    %89 = vector.shape_cast %88 : vector<1x1x8xf32> to vector<1x8xf32>
    %90 = vector.broadcast %89 : vector<1x8xf32> to vector<8x8xf32>
    %91 = arith.addf %87, %90 : vector<8x8xf32>
    %c0_76 = arith.constant 0 : index
    %c3_77 = arith.constant 3 : index
    %c0_78 = arith.constant 0 : index
    %c0_79 = arith.constant 0 : index
    %92 = vector.load %arg3[%c0_76, %c3_77, %c0_78, %c0_79] : memref<1x4x8x8xf32, #tpu.memory_space<vmem>>, vector<1x1x8x8xf32>
    %93 = vector.shape_cast %92 : vector<1x1x8x8xf32> to vector<8x8xf32>
    %cst_80 = arith.constant dense<0.000000e+00> : vector<8x8xf32>
    %94 = tpu.matmul %91, %93, %cst_80 {dimension_numbers = #tpu.dot_dimension_numbers<[1], [0], [0], [1], [0, 0, 1, 1], [], []>} : vector<8x8xf32>, vector<8x8xf32>, vector<8x8xf32> -> vector<8x8xf32>
    %cst_81 = arith.constant dense<0xFF800000> : vector<8xf32>
    %95 = vector.multi_reduction <maximumf>, %94, %cst_81 [1] : vector<8x8xf32> to vector<8xf32>
    %96 = vector.shape_cast %95 : vector<8xf32> to vector<8x1xf32>
    %97 = vector.broadcast %96 : vector<8x1xf32> to vector<8x8xf32>
    %98 = arith.subf %94, %97 : vector<8x8xf32>
    %99 = math.exp %98 : vector<8x8xf32>
    %cst_82 = arith.constant dense<0.000000e+00> : vector<8xf32>
    %100 = vector.multi_reduction <add>, %99, %cst_82 [1] : vector<8x8xf32> to vector<8xf32>
    %101 = vector.shape_cast %100 : vector<8xf32> to vector<8x1xf32>
    %102 = vector.broadcast %101 : vector<8x1xf32> to vector<8x8xf32>
    %103 = arith.divf %99, %102 : vector<8x8xf32>
    %c0_83 = arith.constant 0 : index
    %c3_84 = arith.constant 3 : index
    %c0_85 = arith.constant 0 : index
    %c0_86 = arith.constant 0 : index
    %104 = vector.load %arg4[%c0_83, %c3_84, %c0_85, %c0_86] : memref<1x4x8x8xf32, #tpu.memory_space<vmem>>, vector<1x1x8x8xf32>
    %105 = vector.shape_cast %104 : vector<1x1x8x8xf32> to vector<8x8xf32>
    %cst_87 = arith.constant dense<0.000000e+00> : vector<8x8xf32>
    %106 = tpu.matmul %103, %105, %cst_87 {dimension_numbers = #tpu.dot_dimension_numbers<[1], [0], [0], [1], [0, 0, 1, 1], [], []>} : vector<8x8xf32>, vector<8x8xf32>, vector<8x8xf32> -> vector<8x8xf32>
    %c3_88 = arith.constant 3 : index
    %c0_89 = arith.constant 0 : index
    %c0_90 = arith.constant 0 : index
    %107 = vector.load %arg7[%c3_88, %c0_89, %c0_90] : memref<4x8x128xf32, #tpu.memory_space<vmem>>, vector<1x8x128xf32>
    %108 = vector.shape_cast %107 : vector<1x8x128xf32> to vector<8x128xf32>
    %cst_91 = arith.constant dense<0.000000e+00> : vector<8x128xf32>
    %109 = tpu.matmul %106, %108, %cst_91 {dimension_numbers = #tpu.dot_dimension_numbers<[1], [0], [0], [1], [0, 0, 1, 1], [], []>} : vector<8x8xf32>, vector<8x128xf32>, vector<8x128xf32> -> vector<8x128xf32>
    %110 = arith.addf %83, %109 : vector<8x128xf32>
    %111 = arith.addf %84, %103 : vector<8x8xf32>
    %c0_92 = arith.constant 0 : index
    %c0_93 = arith.constant 0 : index
    %112 = vector.load %arg8[%c0_92, %c0_93] : memref<1x128xf32, #tpu.memory_space<vmem>>, vector<1x128xf32>
    %113 = vector.broadcast %112 : vector<1x128xf32> to vector<8x128xf32>
    %114 = arith.addf %110, %113 : vector<8x128xf32>
    %c0_94 = arith.constant 0 : index
    %c0_95 = arith.constant 0 : index
    %c0_96 = arith.constant 0 : index
    %115 = vector.load %arg9[%c0_94, %c0_95, %c0_96] : memref<1x8x128xf32, #tpu.memory_space<vmem>>, vector<1x8x128xf32>
    %116 = vector.shape_cast %115 : vector<1x8x128xf32> to vector<8x128xf32>
    %117 = vector.shape_cast %114 : vector<8x128xf32> to vector<1x8x128xf32>
    tpu.vector_store %arg9[%c0_94, %c0_95, %c0_96], %117 {strides = array<i32>} : memref<1x8x128xf32, #tpu.memory_space<vmem>>, vector<1x8x128xf32>,
    %cst_97 = arith.constant 2.500000e-01 : f32
    %118 = vector.broadcast %cst_97 : f32 to vector<8x8xf32>
    %119 = arith.mulf %111, %118 : vector<8x8xf32>
    %c0_98 = arith.constant 0 : index
    %c0_99 = arith.constant 0 : index
    %c0_100 = arith.constant 0 : index
    %120 = vector.load %arg10[%c0_98, %c0_99, %c0_100] : memref<1x8x8xf32, #tpu.memory_space<vmem>>, vector<1x8x8xf32>
    %121 = vector.shape_cast %120 : vector<1x8x8xf32> to vector<8x8xf32>
    %122 = vector.shape_cast %119 : vector<8x8xf32> to vector<1x8x8xf32>
    tpu.vector_store %arg10[%c0_98, %c0_99, %c0_100], %122 {strides = array<i32>} : memref<1x8x8xf32, #tpu.memory_space<vmem>>, vector<1x8x8xf32>,
    return
  }
  func.func @transform_0(%arg0: i32, %arg1: i32) -> (i32, i32, i32) {
    %c0_i32 = arith.constant 0 : i32
    %c0_i32_0 = arith.constant 0 : i32
    return %arg0, %arg1, %c0_i32 : i32, i32, i32
  }
  func.func @transform_1(%arg0: i32, %arg1: i32) -> (i32, i32, i32, i32) {
    %c0_i32 = arith.constant 0 : i32
    %c0_i32_0 = arith.constant 0 : i32
    %c0_i32_1 = arith.constant 0 : i32
    %c0_i32_2 = arith.constant 0 : i32
    return %arg0, %c0_i32, %c0_i32_0, %c0_i32_1 : i32, i32, i32, i32
  }
  func.func @transform_2(%arg0: i32, %arg1: i32) -> (i32, i32, i32, i32) {
    %c0_i32 = arith.constant 0 : i32
    %c0_i32_0 = arith.constant 0 : i32
    %c0_i32_1 = arith.constant 0 : i32
    %c0_i32_2 = arith.constant 0 : i32
    return %arg0, %c0_i32, %c0_i32_0, %c0_i32_1 : i32, i32, i32, i32
  }
  func.func @transform_3(%arg0: i32, %arg1: i32) -> (i32, i32, i32) {
    %c0_i32 = arith.constant 0 : i32
    %c0_i32_0 = arith.constant 0 : i32
    %c0_i32_1 = arith.constant 0 : i32
    %c0_i32_2 = arith.constant 0 : i32
    return %c0_i32, %c0_i32_0, %c0_i32_1 : i32, i32, i32
  }
  func.func @transform_4(%arg0: i32, %arg1: i32) -> (i32, i32, i32) {
    %c0_i32 = arith.constant 0 : i32
    %c0_i32_0 = arith.constant 0 : i32
    %c0_i32_1 = arith.constant 0 : i32
    %c0_i32_2 = arith.constant 0 : i32
    return %c0_i32, %c0_i32_0, %c0_i32_1 : i32, i32, i32
  }
  func.func @transform_5(%arg0: i32, %arg1: i32) -> (i32, i32, i32) {
    %c0_i32 = arith.constant 0 : i32
    %c0_i32_0 = arith.constant 0 : i32
    %c0_i32_1 = arith.constant 0 : i32
    %c0_i32_2 = arith.constant 0 : i32
    return %c0_i32, %c0_i32_0, %c0_i32_1 : i32, i32, i32
  }
  func.func @transform_6(%arg0: i32, %arg1: i32) -> (i32, i32) {
    %c0_i32 = arith.constant 0 : i32
    %c0_i32_0 = arith.constant 0 : i32
    %c0_i32_1 = arith.constant 0 : i32
    return %c0_i32, %c0_i32_0 : i32, i32
  }
  func.func @transform_7(%arg0: i32, %arg1: i32) -> (i32, i32, i32) {
    %c0_i32 = arith.constant 0 : i32
    %c0_i32_0 = arith.constant 0 : i32
    return %arg0, %arg1, %c0_i32 : i32, i32, i32
  }
  func.func @transform_8(%arg0: i32, %arg1: i32) -> (i32, i32, i32) {
    %c0_i32 = arith.constant 0 : i32
    %c0_i32_0 = arith.constant 0 : i32
    return %arg0, %arg1, %c0_i32 : i32, i32, i32
  }
}

</mosaic_0001>

<bundles_post_ra>
// kernel: tpu_custom_call.1
= control target key start
LH: loop header
LB: loop body
LE: loop exit
PB: predicated region body
PF: predicated region fallthrough
CT: control target
= control target key end

     0   :  { %s2698_s0 = inlined_call_operand.hbm [shape: f32[2,8,32], index: 0, kind: input, shape index: {}]   ;;  %s2699_s1 = inlined_call_operand.vmem [shape: f32[2,4,8,8], index: 1, kind: input, shape index: {}]   ;;  %s2700_s2 = inlined_call_operand.vmem [shape: f32[2,4,8,8], index: 2, kind: input, shape index: {}]   ;;  %s2701_s3 = inlined_call_operand.vmem [shape: f32[4,32,8], index: 3, kind: input, shape index: {}]   ;;  %s2702_s4 = inlined_call_operand.vmem [shape: f32[4,1,8], index: 4, kind: input, shape index: {}]   ;;  %s2703_s5 = inlined_call_operand.vmem [shape: f32[4,8,128], index: 5, kind: input, shape index: {}]   ;;  %s2704_s6 = inlined_call_operand.vmem [shape: f32[1,128], index: 6, kind: input, shape index: {}]   ;;  %s2705_s7 = inlined_call_operand.hbm [shape: f32[2,8,128], index: 7, kind: output, shape index: {0}]   ;;  %s2706_s8 = inlined_call_operand.hbm [shape: f32[2,8,8], index: 8, kind: output, shape index: {1}]  }
   0x1   :  { %2709 = sst [smem:[#allocation12_spill]] %s2698_s0 }
   0x2   :  { %2710 = sst [smem:[#allocation13_spill]] %s2699_s1 }
   0x3   :  { %14 = vsyncpa [#allocation3], 0 }
   0x4   :  { %16 = vsyncpa [#allocation3 + $0x1], 0 }
   0x5   :  { %17 = vsyncpa [#allocation4], 0 }
   0x6   :  { %19 = vsyncpa [#allocation4 + $0x1], 0 }
   0x7   :  { %20 = vsyncpa [#allocation7], 0 }
   0x8   :  { %22 = vsyncpa [#allocation7 + $0x1], 0  ;;  %s2346_s27 = smov 0   ;;  %s2348_s28 = smov 0  }
   0x9   :  { %s2350_s29 = smov 0   ;;  %s2352_s30 = smov 0  }
   0xa   :  { %s2354_s9 = smov 0   ;;  %s2356_s10 = smov 0  }
   0xb LB: > { %s1856_s11 = sadd.s32 4294967295, %s2294_s10   ;;  %s1857_s12 = sadd.s32 4294967294, %s2294_s10   ;;  %s2294_s10 = sphi %s2356_s10, %s28_s10   ;;  %s2290_s9 = sphi %s2354_s9, %s2727_s9   ;;  %s2286_s30 = sphi %s2352_s30, %s2726_s30   ;;  %s2282_s29 = sphi %s2350_s29, %s2725_s29   ;;  %s2278_s28 = sphi %s2348_s28, %s2724_s28   ;;  %s2274_s27 = sphi %s2346_s27, %s2723_s27  }
   0xc   : > { %s40_s13 = sadd.s32 1, %s2290_s9  ;;  %s49_s14 = sadd.s32 1, %s2282_s29 }
   0xd   : > { %p42_p0 = scmp.ge.s32.totalorder %s40_s13, 2  ;;  %p56_p1 = scmp.ne.s32.totalorder %s2282_s29, %s2278_s28 }
   0xe   : > { %p57_p2 = scmp.eq.s32.totalorder %s2294_s10, 0  ;;  %p62_p3 = scmp.ne.s32.totalorder %s2278_s28, %s2274_s27 }
   0xf   : > { %s2729_s13 = smov (%p42_p0, %s40_s13), 0  ;;  %p63_p5 = scmp.eq.s32.totalorder %s1856_s11, 0 }
  0x10   : > { %2711 = sst [smem:[#allocation11_spill]] %s2729_s13  ;;  %p2387_p4 = por %p57_p2, %p56_p1 }
  0x11   : > { %s44_s16 = ssub.s32 %s2290_s9, %s2729_s13  ;;  %p224_p6 = scmp.eq.s32.totalorder %s1856_s11, 1 }
  0x12   : > { %p47_p7 = scmp.eq.s32.totalorder %s44_s16, 0  ;;  %p2393_p8 = por %p63_p5, %p62_p3 }
  0x13   : > { %p2397_p9 = por %p224_p6, %p56_p1  ;;  %p230_p10 = scmp.eq.s32.totalorder %s1857_s12, 1 }
  0x14   : > { %s2402_s19 = scalar_select %p47_p7, %s2282_s29, %s49_s14  }
  0x15   : > { %p2404_p11 = por %p230_p10, %p62_p3  ;;  %p2088_p13 = scmp.lt.s32.totalorder %s2294_s10, 2 }
  0x16   : > { %s290_s21 = sand.u32 1, %s2282_s29   ;;  %s1861_s23 = sshll.u32 %s2290_s9, 7 }
  0x17   : > { %s2715_s20 = scalar_select %p2404_p11, 1, 0 }
  0x18   : > { %s1860_s22 = sshll.u32 %s290_s21, 3  ;;  %s2716_s0 = sld [smem:[#allocation12_spill]] }
  0x19   : > { %s294_s11 = scalar_lea.vmem [#allocation2], %s1860_s22  ;;  %p2417_p0 = pnand %p2088_p13, %p2387_p4 }
  0x1a   : > { %s302_s16 = sshll.u32 %s294_s11, 4  ;;  %p1862_p1 = scmp.ge.s32.totalorder %s2294_s10, 1  ;;  %s303_s16 = int_to_ptr.vmem [resolvable:$true] %s302_s16 }
  0x1b   : > { %p323_p2 = scmp.lt.s32.totalorder %s2294_s10, 3  ;;  %s291_s14 = scalar_lea.sflag [#allocation3], %s290_s21 }
  0x1c   : > { %p2158_p3 = pneg %p2417_p0  ;;  %s2169_s13 = scalar_lea.vmem %s303_s16, 128 }
  0x1d   : > { %p2170_p5 = scmp.ne.s32.totalorder %s303_s16, %s2169_s13  ;;  %s2296_s24 = smov [#allocation2]  }
  0x1e   : > { %s300_s26 = scalar_lea.hbm %s2716_s0, %s1861_s23  ;;  %s2174_s23 = sshll.u32 %s2296_s24, 4  ;;  %s2175_s23 = int_to_ptr.vmem [resolvable:$false] %s2174_s23 }
  0x1f   : > { %p2172_p6 = pnand %p2170_p5, %p2158_p3  ;;  %s2176_s22 = scalar_lea.vmem %s2175_s23, 256 }
  0x20   : > { %p2177_p10 = scmp.lt.s32.totalorder %s303_s16, %s2175_s23  ;;  %p2178_p12 = scmp.lt.s32.totalorder %s2176_s22, %s2169_s13 }
  0x21   : > { %p2173_p7 = pneg %p2172_p6 }
  0x22   : > { %p2179_p4 = por %p2178_p12, %p2177_p10 }
  0x24   : > { %p2180_p13 = pnand %p2179_p4, %p2173_p7 }
  0x26   : > { %2183 = shalt.err (!%p2180_p13)
}
  0x27   : > { %2080 = dma.hbm_to_vmem [thread:$0]  (!%p2417_p0), %s300_s26, 128, %s303_s16, %s291_s14  }
  0x28   : > { %p324_p11 = pnand %p1862_p1, %p323_p2 }
  0x29   : > { %s2432_s15 = sand.u32 (!%p324_p11), 1, %s2278_s28  }
  0x2a   : > { %327 = sbr.rel (%p324_p11) target bundleno = 3478 (0xd96), region = 48  ;;  %s2435_s21 = sshll.u32 (!%p324_p11), %s2432_s15, 3 }
  0x2b   : > { %s330_s13 = scalar_lea.sflag (!%p324_p11), [#allocation3], %s2432_s15  ;;  %s333_s25 = scalar_lea.vmem (!%p324_p11), [#allocation2], %s2435_s21 }
  0x2f   : > { %2261 = dma.done.wait (%p2393_p8), %s330_s13, 128  }
  0x30   : > { %2263 = vsyncadd (%p2393_p8), %s330_s13, 4294967168  ;;  %v2297_v0 = vmov 0.0   ;;  %vm2298_vm0 = vmmov 0   ;;  %v395_v1 = vld [vmem:[%s2701_s3 + $0x18] sm:$0xff]  ;;  %v394_v2 = vld [vmem:[%s2701_s3 + $0x10] sm:$0xff]  ;;  %vm403_vm1 = vcmask 261120  }
  0x31   : > { %1967 = vmatprep.subr.mxu0 %v2297_v0  ;;  %1975 = vmatprep.mubr.msk.f32.mxu0 %vm2298_vm0, %v2297_v0  ;;  %v393_v3 = vld [vmem:[%s2701_s3 + $0x8] sm:$0xff]  ;;  %v392_v4 = vld [vmem:[%s2701_s3] sm:$0xff]  ;;  %p381_p8 = scmp.lt.s32.totalorder %s2286_s30, 1  ;;  %s2718_s1 = sld [smem:[#allocation13_spill]]  ;;  %vm478_vm2 = vcmask 64512   ;;  %v1877_v23 = vld [vmem:[%s2701_s3 + $0x38] sm:$0xff] }
  0x32   : > { %1978 = vmatprep.subr.mxu1 %v2297_v0  ;;  %1980 = vmatprep.mubr.msk.f32.mxu1 %vm2298_vm0, %v2297_v0  ;;  %v2463_v5 = vld [vmem:[%s333_s25] sm:$0xff]  ;;  %v1876_v24 = vld [vmem:[%s2701_s3 + $0x30] sm:$0xff]  ;;  %v1891_v48 = vld [vmem:[%s2701_s3 + $0x58] sm:$0xff]  ;;  %s1691_s12 = scalar_lea.sflag [#allocation7], %s2432_s15  ;;  %s2299_s14 = smov [#allocation6]  }
  0x33   : > { %1968 = vmatpush3.msra.mxu0 %v395_v1  ;;  %s382_s22 = scalar_select %p381_p8, %s2286_s30, 1  ;;  %v1870_v7 = vld [vmem:[%s2702_s4] ss:$0 sm:$0xff]  ;;  %v1875_v25 = vld [vmem:[%s2701_s3 + $0x28] sm:$0xff]  ;;  %v1879_v30 = vld [vmem:[%s2702_s4 + $0x1] ss:$0 sm:$0xff] }
  0x34   : > { %1969 = vmatprep.subr.mxu0 %v2297_v0  ;;  %v1874_v26 = vld [vmem:[%s2701_s3 + $0x20] sm:$0xff]  ;;  %v1885_v43 = vld [vmem:[%s2703_s5 + $0x8] sm:$0xff]  ;;  %v1890_v50 = vld [vmem:[%s2701_s3 + $0x50] sm:$0xff] }
  0x35   : > { %1970 = vmatpush3.msra.mxu0 %v394_v2  ;;  %s1921_s13 = sshll.u32 %s382_s22, 5  ;;  %v637_v47 = vld [vmem:[%s2703_s5] sm:$0xff]  ;;  %v1889_v52 = vld [vmem:[%s2701_s3 + $0x48] sm:$0xff]  ;;  %s380_s22 = scalar_lea.vmem [#allocation6], %s2435_s21 }
  0x36   : > { %1971 = vmatprep.subr.mxu0 %v2297_v0  ;;  %s2491_s24 = scalar_lea.vmem %s2700_s2, %s1921_s13  ;;  %v1888_v54 = vld [vmem:[%s2701_s3 + $0x40] sm:$0xff]  ;;  %s1719_s16 = sshll.u32 %s380_s22, 4  ;;  %s1720_s16 = int_to_ptr.vmem [resolvable:$true] %s1719_s16 }
  0x37   : > { %1972 = vmatpush3.msra.mxu0 %v393_v3  ;;  %s2476_s25 = scalar_lea.vmem %s2718_s1, %s1921_s13  ;;  %v563_v19 = vld [vmem:[%s2491_s24] sm:$0xff]  ;;  %v1883_v42 = vld [vmem:[%s2491_s24 + $0x8] sm:$0xff]  ;;  %s2184_s17 = scalar_lea.vmem %s1720_s16, 128 }
  0x38   : > { %1973 = vmatprep.subr.mxu0 %v2297_v0  ;;  %v477_v6 = vld [vmem:[%s2476_s25] sm:$0xff]  ;;  %v1881_v27 = vld [vmem:[%s2476_s25 + $0x8] sm:$0xff]  ;;  %v1895_v56 = vld [vmem:[%s2476_s25 + $0x10] sm:$0xff]  ;;  %p2185_p11 = scmp.ne.s32.totalorder %s1720_s16, %s2184_s17 }
  0x39   : > { %1974 = vmatpush3.msra.mxu0 %v392_v4  ;;  %1979 = vmatpush3.msra.mxu1 %v477_v6  ;;  %v1893_v59 = vld [vmem:[%s2702_s4 + $0x2] ss:$0 sm:$0xff] }
  0x3a   : > { %1976 = vmatmul.mubr.msk.f32.vlgmr.msra.gmra.mxu0 %vm403_vm1, %v2463_v5  ;;  %1999 = vmatprep.subr.mxu0 %v2297_v0  ;;  %p2186_p12 = pnand %p2185_p11, %p2397_p9 }
  0x3b   : > { %2001 = vmatprep.mubr.msk.f32.mxu0 %vm2298_vm0, %v2297_v0  ;;  %1983 = vmatprep.subr.mxu1 %v2297_v0 }
  0x3c   : > { %2000 = vmatpush3.msra.mxu0 %v1881_v27  ;;  %p2187_p0 = pneg %p2186_p12 }
  0x3d   : > { %2004 = vmatprep.subr.mxu0 %v2297_v0 }
  0xfa   : > { %v473_v8 = vpop.f32.mrf.mxu0 }
  0xfb   : > { %v474_v9 = vadd.f32 %v1870_v7, %v473_v8 }
  0xfc   : > { %v1977_v10 = vpop.f32.mrf.mxu0 }
  0xfd   : > { %1981 = vmatmul.mubr.msk.f32.vlgmr.msra.gmra.mxu1 %vm478_vm2, %v474_v9  ;;  %v1897_v9 = vld [vmem:[%s2491_s24 + $0x10] sm:$0xff] }
  0xfe   : > { %1985 = vmatprep.mubr.msk.f32.mxu1 %vm2298_vm0, %v2297_v0  ;;  %1984 = vmatpush3.msra.mxu1 %v563_v19  ;;  %v1899_v19 = vld [vmem:[%s2703_s5 + $0x10] sm:$0xff] }
  0xff   : > { %1988 = vmatprep.subr.mxu1 %v2297_v0 }
 0x1bd   : > { %v548_v11 = vpop.f32.mrf.mxu1 }
 0x1be   : > { %v552_v12 = vsel %vm478_vm2, %v548_v11, -inf }
 0x1bf   : > { %553 = vmax.xlane.f32.xlu0 %v552_v12  ;;  %v1982_v13 = vpop.f32.mrf.mxu1 }
 0x248   : > { %v554_v14 = vpop.xlane.xlu0 %553 }
 0x249   : > { %v555_v15 = vsub.f32 %v548_v11, %v554_v14  ;;  %v1904_v14 = vld [vmem:[%s2701_s3 + $0x78] sm:$0xff] }
 0x24b   : > { %v556_v16 = vmul.f32 1.442695, %v555_v15 }
 0x24d   : > { %2140 = vpow2.f32 %v556_v16  ;;  %v1903_v16 = vld [vmem:[%s2701_s3 + $0x70] sm:$0xff] }
 0x25a   : > { %v2141_v17 = vpop.eup %2140 }
 0x25b   : > { %v558_v18 = vsel %vm478_vm2, %v2141_v17, 0.0 }
 0x25c   : > { %559 = vadd.xlane.f32.xlu0 %v558_v18  ;;  %v1901_v18 = vld [vmem:[%s2701_s3 + $0x60] sm:$0xff] }
 0x2e5   : > { %v560_v20 = vpop.xlane.xlu0 %559 }
 0x2e6   : > { %2142 = vrcp.f32 %v560_v20  ;;  %v1908_v20 = vld [vmem:[%s2476_s25 + $0x18] sm:$0xff]  ;;  %s2188_s25 = sshll.u32 %s2299_s14, 4  ;;  %s2189_s25 = int_to_ptr.vmem [resolvable:$false] %s2188_s25 }
 0x2e7   : > { %s2190_s23 = scalar_lea.vmem %s2189_s25, 256  ;;  %p2191_p1 = scmp.lt.s32.totalorder %s1720_s16, %s2189_s25 }
 0x2e8   : > { %p2192_p2 = scmp.lt.s32.totalorder %s2190_s23, %s2184_s17 }
 0x2ea   : > { %p2193_p3 = por %p2192_p2, %p2191_p1 }
 0x2ec   : > { %p2194_p5 = pnand %p2193_p3, %p2187_p0 }
 0x2f3   : > { %v2143_v21 = vpop.eup %2142 }
 0x2f4   : > { %v2495_v22 = vmul.f32 %v2143_v21, %v2141_v17  ;;  %v1902_v17 = vld [vmem:[%s2701_s3 + $0x68] sm:$0xff] }
 0x2f6   : > { %1986 = vmatmul.mubr.msk.f32.vlgmr.msra.gmra.mxu1 %vm478_vm2, %v2495_v22 }
 0x2f7   : > { %1989 = vmatpush3.msra.mxu1 %v1877_v23  ;;  %1996 = vmatprep.mubr.msk.f32.mxu1 %vm2298_vm0, %v2297_v0 }
 0x2f8   : > { %1990 = vmatprep.subr.mxu1 %v2297_v0 }
 0x2f9   : > { %1991 = vmatpush3.msra.mxu1 %v1876_v24 }
 0x2fa   : > { %1992 = vmatprep.subr.mxu1 %v2297_v0 }
 0x2fb   : > { %1993 = vmatpush3.msra.mxu1 %v1875_v25 }
 0x2fc   : > { %1994 = vmatprep.subr.mxu1 %v2297_v0 }
 0x2fd   : > { %1995 = vmatpush3.msra.mxu1 %v1874_v26 }
 0x2fe   : > { %1997 = vmatmul.mubr.msk.f32.vlgmr.msra.gmra.mxu1 %vm403_vm1, %v2463_v5  ;;  %2009 = vmatprep.subr.mxu1 %v2297_v0 }
 0x2ff   : > { %2011 = vmatprep.mubr.msk.f32.mxu1 %vm2298_vm0, %v2297_v0  ;;  %2010 = vmatpush3.msra.mxu1 %v1885_v43 }
 0x300   : > { %2019 = vmatprep.subr.mxu1 %v2297_v0 }
 0x3b6   : > { %v633_v28 = vpop.f32.mrf.mxu1 }
 0x3b8   : > { %v1987_v29 = vpop.f32.mrf.mxu1 }
 0x3be   : > { %v718_v31 = vpop.f32.mrf.mxu1 }
 0x3bf   : > { %v719_v32 = vadd.f32 %v1879_v30, %v718_v31 }
 0x3c0   : > { %v1998_v33 = vpop.f32.mrf.mxu1 }
 0x3c1   : > { %2002 = vmatmul.mubr.msk.f32.vlgmr.msra.gmra.mxu0 %vm478_vm2, %v719_v32 }
 0x3c2   : > { %2006 = vmatprep.mubr.msk.f32.mxu0 %vm2298_vm0, %v2297_v0  ;;  %2005 = vmatpush3.msra.mxu0 %v1883_v42 }
 0x3c3   : > { %2014 = vmatprep.subr.mxu0 %v2297_v0 }
 0x481   : > { %v793_v34 = vpop.f32.mrf.mxu0 }
 0x482   : > { %v797_v35 = vsel %vm478_vm2, %v793_v34, -inf }
 0x483   : > { %798 = vmax.xlane.f32.xlu1 %v797_v35  ;;  %v2003_v36 = vpop.f32.mrf.mxu0 }
 0x50c   : > { %v799_v37 = vpop.xlane.xlu1 %798 }
 0x50d   : > { %v800_v38 = vsub.f32 %v793_v34, %v799_v37 }
 0x50f   : > { %v801_v39 = vmul.f32 1.442695, %v800_v38  ;;  %v1912_v38 = vld [vmem:[%s2703_s5 + $0x18] sm:$0xff] }
 0x511   : > { %2144 = vpow2.f32 %v801_v39 }
 0x51e   : > { %v2145_v40 = vpop.eup %2144 }
 0x51f   : > { %v803_v41 = vsel %vm478_vm2, %v2145_v40, 0.0 }
 0x520   : > { %804 = vadd.xlane.f32.xlu1 %v803_v41 }
 0x5a9   : > { %v805_v44 = vpop.xlane.xlu1 %804 }
 0x5aa   : > { %2146 = vrcp.f32 %v805_v44 }
 0x5b7   : > { %v2147_v45 = vpop.eup %2146 }
 0x5b8   : > { %v807_v46 = vmul.f32 %v2147_v45, %v2145_v40 }
 0x5ba   : > { %2007 = vmatmul.mubr.msk.f32.vlgmr.msra.gmra.mxu0 %vm478_vm2, %v807_v46  ;;  %v1031_v12 = vadd.f32 %v807_v46, %v2495_v22 }
 0x5bb   : > { %2015 = vmatpush3.msra.mxu0 %v637_v47  ;;  %2016 = vmatprep.mubr.msk.f32.mxu0 %vm2298_vm0, %v2297_v0 }
 0x5bc   : > { %2030 = vmatprep.subr.mxu0 %v2297_v0 }
 0x5be   : > { %2017 = vmatmul.mubr.msk.f32.vlgmr.msra.gmra.mxu0 %vm478_vm2, %v633_v28 }
 0x5bf   : > { %2032 = vmatprep.mubr.msk.f32.mxu0 %vm2298_vm0, %v2297_v0  ;;  %2031 = vmatpush3.msra.mxu0 %v1895_v56 }
 0x5c0   : > { %2035 = vmatprep.subr.mxu0 %v2297_v0 }
 0x67a   : > { %v879_v49 = vpop.f32.mrf.mxu0 }
 0x67b   : > { %2012 = vmatmul.mubr.msk.f32.vlgmr.msra.gmra.mxu1 %vm478_vm2, %v879_v49 }
 0x67c   : > { %2020 = vmatpush3.msra.mxu1 %v1891_v48  ;;  %v2008_v51 = vpop.f32.mrf.mxu0  ;;  %2027 = vmatprep.mubr.msk.f32.mxu1 %vm2298_vm0, %v2297_v0 }
 0x67d   : > { %2021 = vmatprep.subr.mxu1 %v2297_v0 }
 0x67e   : > { %2022 = vmatpush3.msra.mxu1 %v1890_v50  ;;  %v2560_v53 = vpop.f32.mrf.mxu0 }
 0x67f   : > { %2023 = vmatprep.subr.mxu1 %v2297_v0 }
 0x680   : > { %2024 = vmatpush3.msra.mxu1 %v1889_v52  ;;  %v2018_v55 = vpop.f32.mrf.mxu0 }
 0x681   : > { %2025 = vmatprep.subr.mxu1 %v2297_v0 }
 0x682   : > { %2026 = vmatpush3.msra.mxu1 %v1888_v54 }
 0x683   : > { %2028 = vmatmul.mubr.msk.f32.vlgmr.msra.gmra.mxu1 %vm403_vm1, %v2463_v5  ;;  %2040 = vmatprep.subr.mxu1 %v2297_v0 }
 0x684   : > { %2042 = vmatprep.mubr.msk.f32.mxu1 %vm2298_vm0, %v2297_v0  ;;  %2041 = vmatpush3.msra.mxu1 %v1899_v19 }
 0x685   : > { %2056 = vmatprep.subr.mxu1 %v2297_v0 }
 0x73b   : > { %v954_v57 = vpop.f32.mrf.mxu1 }
 0x73c   : > { %v1028_v26 = vadd.f32 %v2560_v53, %v954_v57 }
 0x73d   : > { %v2013_v58 = vpop.f32.mrf.mxu1 }
 0x743   : > { %v1111_v60 = vpop.f32.mrf.mxu1 }
 0x744   : > { %v1112_v61 = vadd.f32 %v1893_v59, %v1111_v60 }
 0x745   : > { %v2029_v62 = vpop.f32.mrf.mxu1 }
 0x746   : > { %2033 = vmatmul.mubr.msk.f32.vlgmr.msra.gmra.mxu0 %vm478_vm2, %v1112_v61 }
 0x747   : > { %2037 = vmatprep.mubr.msk.f32.mxu0 %vm2298_vm0, %v2297_v0  ;;  %2036 = vmatpush3.msra.mxu0 %v1897_v9 }
 0x748   : > { %2045 = vmatprep.subr.mxu0 %v2297_v0 }
 0x806   : > { %v1186_v63 = vpop.f32.mrf.mxu0 }
 0x807   : > { %v1190_v1 = vsel %vm478_vm2, %v1186_v63, -inf }
 0x808   : > { %1191 = vmax.xlane.f32.xlu0 %v1190_v1  ;;  %v2034_v2 = vpop.f32.mrf.mxu0 }
 0x891   : > { %v1192_v3 = vpop.xlane.xlu0 %1191 }
 0x892   : > { %v1193_v4 = vsub.f32 %v1186_v63, %v1192_v3 }
 0x894   : > { %v1194_v6 = vmul.f32 1.442695, %v1193_v4 }
 0x896   : > { %2148 = vpow2.f32 %v1194_v6 }
 0x8a3   : > { %v2149_v7 = vpop.eup %2148 }
 0x8a4   : > { %v1196_v8 = vsel %vm478_vm2, %v2149_v7, 0.0 }
 0x8a5   : > { %1197 = vadd.xlane.f32.xlu1 %v1196_v8 }
 0x92e   : > { %v1198_v10 = vpop.xlane.xlu1 %1197 }
 0x92f   : > { %2150 = vrcp.f32 %v1198_v10 }
 0x93c   : > { %v2151_v11 = vpop.eup %2150 }
 0x93d   : > { %v1200_v13 = vmul.f32 %v2151_v11, %v2149_v7 }
 0x93f   : > { %2038 = vmatmul.mubr.msk.f32.vlgmr.msra.gmra.mxu0 %vm478_vm2, %v1200_v13  ;;  %v1352_v15 = vadd.f32 %v1200_v13, %v1031_v12 }
 0x940   : > { %2046 = vmatpush3.msra.mxu0 %v1904_v14  ;;  %2053 = vmatprep.mubr.msk.f32.mxu0 %vm2298_vm0, %v2297_v0 }
 0x941   : > { %2047 = vmatprep.subr.mxu0 %v2297_v0 }
 0x942   : > { %2048 = vmatpush3.msra.mxu0 %v1903_v16 }
 0x943   : > { %2049 = vmatprep.subr.mxu0 %v2297_v0 }
 0x944   : > { %2050 = vmatpush3.msra.mxu0 %v1902_v17 }
 0x945   : > { %2051 = vmatprep.subr.mxu0 %v2297_v0 }
 0x946   : > { %2052 = vmatpush3.msra.mxu0 %v1901_v18 }
 0x947   : > { %2054 = vmatmul.mubr.msk.f32.vlgmr.msra.gmra.mxu0 %vm403_vm1, %v2463_v5  ;;  %2066 = vmatprep.subr.mxu0 %v2297_v0  ;;  %v1906_v5 = vld [vmem:[%s2702_s4 + $0x3] ss:$0 sm:$0xff] }
 0x948   : > { %2068 = vmatprep.mubr.msk.f32.mxu0 %vm2298_vm0, %v2297_v0  ;;  %2067 = vmatpush3.msra.mxu0 %v1912_v38 }
 0x9ff   : > { %v1272_v21 = vpop.f32.mrf.mxu0 }
 0xa00   : > { %2043 = vmatmul.mubr.msk.f32.vlgmr.msra.gmra.mxu1 %vm478_vm2, %v1272_v21 }
 0xa01   : > { %v2039_v22 = vpop.f32.mrf.mxu0  ;;  %2057 = vmatpush3.msra.mxu1 %v1908_v20  ;;  %2058 = vmatprep.mubr.msk.f32.mxu1 %vm2298_vm0, %v2297_v0 }
 0xa02   : > { %2061 = vmatprep.subr.mxu1 %v2297_v0 }
 0xa07   : > { %v1432_v23 = vpop.f32.mrf.mxu0 }
 0xa08   : > { %v1433_v24 = vadd.f32 %v1906_v5, %v1432_v23 }
 0xa09   : > { %v2055_v25 = vpop.f32.mrf.mxu0 }
 0xa0a   : > { %2059 = vmatmul.mubr.msk.f32.vlgmr.msra.gmra.mxu1 %vm478_vm2, %v1433_v24 }
 0xa0b   : > { %2063 = vmatprep.mubr.msk.f32.mxu1 %vm2298_vm0, %v2297_v0  ;;  %v1910_v0 = vld [vmem:[%s2491_s24 + $0x18] sm:$0xff]  ;;  %s2708_s24 = sshll.u32 %s2286_s30, 7 }
 0xa0c   : > { %2062 = vmatpush3.msra.mxu1 %v1910_v0  ;;  %s1717_s11 = scalar_lea.hbm %s2706_s8, %s2708_s24 }
 0xac0   : > { %v1347_v27 = vpop.f32.mrf.mxu1 }
 0xac1   : > { %v1351_v28 = vadd.f32 %v1347_v27, %v1028_v26 }
 0xac2   : > { %v2044_v29 = vpop.f32.mrf.mxu1 }
 0xaca   : > { %v1507_v30 = vpop.f32.mrf.mxu1 }
 0xacb   : > { %v1511_v31 = vsel %vm478_vm2, %v1507_v30, -inf }
 0xacc   : > { %1512 = vmax.xlane.f32.xlu0 %v1511_v31  ;;  %v2060_v32 = vpop.f32.mrf.mxu1 }
 0xb55   : > { %v1513_v33 = vpop.xlane.xlu0 %1512 }
 0xb56   : > { %v1514_v34 = vsub.f32 %v1507_v30, %v1513_v33 }
 0xb58   : > { %v1515_v35 = vmul.f32 1.442695, %v1514_v34 }
 0xb5a   : > { %2152 = vpow2.f32 %v1515_v35 }
 0xb67   : > { %v2153_v36 = vpop.eup %2152 }
 0xb68   : > { %v1517_v37 = vsel %vm478_vm2, %v2153_v36, 0.0 }
 0xb69   : > { %1518 = vadd.xlane.f32.xlu1 %v1517_v37 }
 0xbf2   : > { %v1519_v39 = vpop.xlane.xlu1 %1518 }
 0xbf3   : > { %2154 = vrcp.f32 %v1519_v39 }
 0xc00   : > { %v2155_v40 = vpop.eup %2154 }
 0xc01   : > { %v1521_v41 = vmul.f32 %v2155_v40, %v2153_v36 }
 0xc03   : > { %2064 = vmatmul.mubr.msk.f32.vlgmr.msra.gmra.mxu1 %vm478_vm2, %v1521_v41  ;;  %v1673_v42 = vadd.f32 %v1521_v41, %v1352_v15 }
 0xc05   : > { %v1683_v43 = vmul.f32 0.25, %v1673_v42 }
 0xc07   : > { %1684 = vst.msk [vmem:[%s380_s22] sm:$0xff] %vm478_vm2, %v1683_v43 }
 0xcc3   : > { %v1593_v44 = vpop.f32.mrf.mxu1 }
 0xcc4   : > { %2069 = vmatmul.mubr.msk.f32.vlgmr.msra.gmra.mxu0 %vm478_vm2, %v1593_v44 }
 0xcc5   : > { %v2065_v45 = vpop.f32.mrf.mxu1 }
 0xcc6   : > { %2197 = shalt.err (!%p2194_p5)
}
 0xcc7   : > { %s2198_s0 = scalar_lea.hbm %s1717_s11, 128  ;;  %s2202_s26 = scalar_lea.hbm %s2706_s8, 256 }
 0xcc8   : > { %p2199_p6 = scmp.ne.s32.totalorder %s1717_s11, %s2198_s0  ;;  %p2203_p4 = scmp.lt.s32.totalorder %s1717_s11, %s2706_s8 }
 0xcc9   : > { %p2204_p13 = scmp.lt.s32.totalorder %s2202_s26, %s2198_s0 }
 0xcca   : > { %p2200_p7 = pnand %p2199_p6, %p2397_p9 }
 0xccb   : > { %p2205_p8 = por %p2204_p13, %p2203_p4 }
 0xccc   : > { %p2201_p10 = pneg %p2200_p7 }
 0xcce   : > { %p2206_p11 = pnand %p2205_p8, %p2201_p10 }
 0xcd0   : > { %2209 = shalt.err (!%p2206_p11)
}
 0xcd1   : > { %2074 = dma.vmem_to_hbm [thread:$0]  (%p2397_p9), %s1720_s16, 128, %s1717_s11, %s1691_s12   ;;  %v1914_v47 = vld [vmem:[%s2704_s6] ss:$0 sm:$0xff] }
 0xcd2   : > { %s373_s25 = scalar_lea.vmem [#allocation5], %s2435_s21  ;;  %s2719_s0 = sshll.u32 %s2286_s30, 7 }
 0xcd3   : > { %s1705_s23 = sshll.u32 %s373_s25, 4  ;;  %s1703_s22 = scalar_lea.hbm %s2705_s7, %s2719_s0  ;;  %s1706_s23 = int_to_ptr.vmem [resolvable:$true] %s1705_s23 }
 0xcd4   : > { %s1686_s13 = scalar_lea.sflag [#allocation4], %s2432_s15  ;;  %s2210_s26 = scalar_lea.vmem %s1706_s23, 128 }
 0xcd5   : > { %p2211_p12 = scmp.ne.s32.totalorder %s1706_s23, %s2210_s26  ;;  %s2300_s11 = smov [#allocation5]  }
 0xcd6   : > { %s2214_s16 = sshll.u32 %s2300_s11, 4  ;;  %s2215_s16 = int_to_ptr.vmem [resolvable:$false] %s2214_s16 }
 0xcd7   : > { %p2212_p0 = pnand %p2211_p12, %p2397_p9  ;;  %s2216_s21 = scalar_lea.vmem %s2215_s16, 256 }
 0xcd8   : > { %p2217_p2 = scmp.lt.s32.totalorder %s1706_s23, %s2215_s16  ;;  %p2218_p3 = scmp.lt.s32.totalorder %s2216_s21, %s2210_s26 }
 0xcd9   : > { %p2213_p1 = pneg %p2212_p0 }
 0xcda   : > { %p2219_p5 = por %p2218_p3, %p2217_p2 }
 0xcdc   : > { %p2220_p6 = pnand %p2219_p5, %p2213_p1 }
 0xd84   : > { %v1668_v46 = vpop.f32.mrf.mxu0 }
 0xd85   : > { %v1672_v48 = vadd.f32 %v1668_v46, %v1351_v28 }
 0xd86   : > { %v2070_v49 = vpop.f32.mrf.mxu0 }
 0xd87   : > { %v1681_v50 = vadd.f32 %v1914_v47, %v1672_v48 }
 0xd89   : > { %1682 = vst [vmem:[%s373_s25] sm:$0xff] %v1681_v50 }
 0xd8a   : > { %2223 = shalt.err (!%p2220_p6)
}
 0xd8b   : > { %s2224_s30 = scalar_lea.hbm %s1703_s22, 128  ;;  %s2228_s17 = scalar_lea.hbm %s2705_s7, 256 }
 0xd8c   : > { %p2225_p7 = scmp.ne.s32.totalorder %s1703_s22, %s2224_s30  ;;  %p2229_p13 = scmp.lt.s32.totalorder %s1703_s22, %s2705_s7 }
 0xd8d   : > { %p2230_p8 = scmp.lt.s32.totalorder %s2228_s17, %s2224_s30 }
 0xd8e   : > { %p2226_p10 = pnand %p2225_p7, %p2397_p9 }
 0xd8f   : > { %p2231_p11 = por %p2230_p8, %p2229_p13 }
 0xd90   : > { %p2227_p4 = pneg %p2226_p10 }
 0xd92   : > { %p2232_p12 = pnand %p2231_p11, %p2227_p4 }
 0xd94   : > { %2235 = shalt.err (!%p2232_p12)
}
 0xd95   : > { %2073 = dma.vmem_to_hbm [thread:$0]  (%p2397_p9), %s1706_s23, 128, %s1703_s22, %s1686_s13  }
 0xd96 PF: > { %s1731_s0 = sand.u32 1, %s2274_s27   ;;  %p2720_p0 = scmp.ne.s32.totalorder %s2715_s20, 0 }
 0xd97   : > { %p2721_p1 = scmp.ge.s32.totalorder %s2294_s10, 2  ;;  %s1732_s1 = scalar_lea.sflag [#allocation4], %s1731_s0 }
 0xd99   : > { %p2082_p2 = pnand %p2721_p1, %p2720_p0 }
 0xd9b   : > { %p2083_p3 = pneg %p2082_p2 }
 0xd9d   : > { %2265 = dma.done.wait (%p2083_p3), %s1732_s1, 128  }
 0xd9e   : > { %2267 = vsyncadd (%p2083_p3), %s1732_s1, 4294967168  ;;  %s1741_s24 = scalar_lea.sflag [#allocation7], %s1731_s0 }
 0xd9f   : > { %2269 = dma.done.wait (%p2083_p3), %s1741_s24, 128  }
 0xda0   : > { %2271 = vsyncadd (%p2083_p3), %s1741_s24, 4294967168  ;;  %s28_s10 = sadd.s32 1, %s2294_s10   ;;  %s2722_s18 = sld [smem:[#allocation11_spill]] }
 0xda1   : > { %p25_p5 = scmp.ge.s32.totalorder %s28_s10, 4   ;;  %s2723_s27 = smov %s2278_s28 }
 0xda2   : > { %s2724_s28 = smov %s2282_s29  ;;  %s2725_s29 = smov %s2402_s19 }
 0xda3   : > { %s2726_s30 = smov %s2290_s9  ;;  %27 = sbr.rel (!%p25_p5) target bundleno = 11 (0xb), region = 131 }
 0xda6   : > { %s2727_s9 = smov %s2722_s18 }
 0xda8   :  { %1746 = vsyncpa [#allocation3], 1 }
 0xda9   :  { %1748 = vsyncpa [#allocation3 + $0x1], 1 }
 0xdaa   :  { %1749 = vsyncpa [#allocation4], 1 }
 0xdab   :  { %1751 = vsyncpa [#allocation4 + $0x1], 1 }
 0xdac   :  { %1752 = vsyncpa [#allocation7], 1 }
 0xdad   :  { %1754 = vsyncpa [#allocation7 + $0x1], 1 }

</bundles_post_ra>
